<compile_context>
chip_gen: v7x
topology: tpu7x:2x2x1
jax: 0.10.0
libtpu: 0.0.40
codegen_flags: <defaults>
</compile_context>

<pallas_src>
import jax
import jax.numpy as jnp
from jax.experimental import pallas as pl
from jax.experimental.pallas import tpu as pltpu

IN_DIM = 28 * 28          # 784
H1, H2, H3 = 128, 64, 32
OUT_DIM = 10
OUT_PAD = 128             # lane-dense padded logits width


def mlp_kernel(x_ref, w1_ref, b1_ref, w2_ref, b2_ref,
               w3_ref, b3_ref, w4_ref, b4_ref, o_ref):
    # Layer 1: (T,784) @ (784,128) + (1,128) -> ReLU
    h = jnp.dot(x_ref[...], w1_ref[...],
                preferred_element_type=jnp.float32) + b1_ref[...]
    h = jnp.maximum(h, 0.0)
    # Layer 2: (T,128) @ (128,64) + (1,64) -> ReLU
    h = jnp.dot(h, w2_ref[...],
                preferred_element_type=jnp.float32) + b2_ref[...]
    h = jnp.maximum(h, 0.0)
    # Layer 3: (T,64) @ (64,32) + (1,32) -> ReLU
    h = jnp.dot(h, w3_ref[...],
                preferred_element_type=jnp.float32) + b3_ref[...]
    h = jnp.maximum(h, 0.0)
    # Layer 4 (logits, padded to 128 lanes, no activation)
    o_ref[...] = (jnp.dot(h, w4_ref[...],
                          preferred_element_type=jnp.float32) + b4_ref[...])


def _round_up(x, m):
    return ((x + m - 1) // m) * m


def neural_network_forward(x, params, tile_b=512):
    """x: (B, 28, 28) any float/int dtype. Returns (B, 10) float32 logits."""
    B = x.shape[0]
    # torch.nn.Flatten + .to(torch.float32)
    x_flat = jnp.reshape(x, (B, IN_DIM)).astype(jnp.float32)

    (w1, b1), (w2, b2), (w3, b3), (w4, b4) = params

    # Pad final layer to lane-dense OUT_PAD columns (zeros -> zero logits
    # in the extra columns; sliced off below).
    w4p = jnp.pad(w4, ((0, 0), (0, OUT_PAD - w4.shape[1])))
    b4p = jnp.pad(b4, ((0, 0), (0, OUT_PAD - b4.shape[1])))

    # Tile the batch. For small B the tile collapses to round_up(B, 8) and the
    # grid has a single step (no pipelining overhead for tiny inference).
    tile_b = min(tile_b, _round_up(B, 8))
    padded_b = _round_up(B, tile_b)
    if padded_b != B:
        x_flat = jnp.pad(x_flat, ((0, padded_b - B), (0, 0)))

    grid = (padded_b // tile_b,)

    def batch_map(i):
        return (i, 0)

    def const_map(i):
        return (0, 0)

    weight_bytes = 4 * (IN_DIM * H1 + H1 * H2 + H2 * H3 + H3 * OUT_PAD
                        + H1 + H2 + H3 + OUT_PAD)
    cost = pl.CostEstimate(
        flops=2 * padded_b * (IN_DIM * H1 + H1 * H2 + H2 * H3 + H3 * OUT_PAD),
        transcendentals=0,
        bytes_accessed=padded_b * IN_DIM * 4 + weight_bytes
                       + padded_b * OUT_PAD * 4,
    )

    out = pl.pallas_call(
        mlp_kernel,
        out_shape=jax.ShapeDtypeStruct((padded_b, OUT_PAD), jnp.float32),
        grid=grid,
        in_specs=[
            pl.BlockSpec((tile_b, IN_DIM), batch_map),   # x tile advances
            pl.BlockSpec((IN_DIM, H1), const_map),       # weights/biases stay
            pl.BlockSpec((1, H1), const_map),            #   VMEM-resident
            pl.BlockSpec((H1, H2), const_map),
            pl.BlockSpec((1, H2), const_map),
            pl.BlockSpec((H2, H3), const_map),
            pl.BlockSpec((1, H3), const_map),
            pl.BlockSpec((H3, OUT_PAD), const_map),
            pl.BlockSpec((1, OUT_PAD), const_map),
        ],
        out_specs=pl.BlockSpec((tile_b, OUT_PAD), batch_map),
        compiler_params=pltpu.CompilerParams(
            dimension_semantics=("parallel",),
        ),
        cost_estimate=cost,
    )(x_flat, w1, b1, w2, b2, w3, b3, w4p, b4p)

    return out[:B, :OUT_DIM]


def init_params(key):
    """Deterministic init mirroring torch.nn.Linear shapes.

    PyTorch Linear(i, o) stores weight (o, i); we store the transpose (i, o)
    so the kernel can do x @ W directly. Biases are kept as (1, o).
    """
    dims = [(IN_DIM, H1), (H1, H2), (H2, H3), (H3, OUT_DIM)]
    params = []
    for (fan_in, fan_out) in dims:
        key, kw, kb = jax.random.split(key, 3)
        bound = 1.0 / jnp.sqrt(fan_in)  # same scale as torch default init
        w = jax.random.uniform(kw, (fan_in, fan_out), jnp.float32,
                               minval=-bound, maxval=bound)
        b = jax.random.uniform(kb, (1, fan_out), jnp.float32,
                               minval=-bound, maxval=bound)
        params.append((w, b))
    return params


def reference_forward(x, params):
    """Pure-JAX reference for correctness check."""
    B = x.shape[0]
    h = jnp.reshape(x, (B, IN_DIM)).astype(jnp.float32)
    (w1, b1), (w2, b2), (w3, b3), (w4, b4) = params
    h = jnp.maximum(h @ w1 + b1, 0.0)
    h = jnp.maximum(h @ w2 + b2, 0.0)
    h = jnp.maximum(h @ w3 + b3, 0.0)
    return h @ w4 + b4


if __name__ == "__main__":
    key = jax.random.PRNGKey(0)
    key, kx = jax.random.split(key)

    B = 4
    x = jax.random.normal(kx, (B, 28, 28), dtype=jnp.float32)
    params = init_params(key)

    out = neural_network_forward(x, params)
    out = jax.block_until_ready(out)

    ref = reference_forward(x, params)
    assert out.shape == (B, OUT_DIM), out.shape
    assert jnp.allclose(out, ref, atol=1e-5, rtol=1e-5), "mismatch vs reference"

    print("KERNEL_OK")
</pallas_src>

<mosaic_0001>
module attributes {stable_mosaic.version = 11 : i64} {
  func.func @mlp_kernel(%arg0: i32, %arg1: memref<8x784xf32, #tpu.memory_space<vmem>>, %arg2: memref<784x128xf32, #tpu.memory_space<vmem>>, %arg3: memref<1x128xf32, #tpu.memory_space<vmem>>, %arg4: memref<128x64xf32, #tpu.memory_space<vmem>>, %arg5: memref<1x64xf32, #tpu.memory_space<vmem>>, %arg6: memref<64x32xf32, #tpu.memory_space<vmem>>, %arg7: memref<1x32xf32, #tpu.memory_space<vmem>>, %arg8: memref<32x128xf32, #tpu.memory_space<vmem>>, %arg9: memref<1x128xf32, #tpu.memory_space<vmem>>, %arg10: memref<8x128xf32, #tpu.memory_space<vmem>>) attributes {dimension_semantics = [#tpu.dimension_semantics<parallel>], iteration_bounds = array<i64: 1>, scalar_prefetch = 0 : i64, scratch_operands = 0 : i64, tpu.core_type = #tpu.core_type<tc>, window_params = [{transform_indices = @transform_0, window_bounds = array<i64: 8, 784>}, {pipeline_mode = #tpu.pipeline_mode<synchronous>, transform_indices = @transform_1, window_bounds = array<i64: 784, 128>}, {pipeline_mode = #tpu.pipeline_mode<synchronous>, transform_indices = @transform_2, window_bounds = array<i64: 1, 128>}, {pipeline_mode = #tpu.pipeline_mode<synchronous>, transform_indices = @transform_3, window_bounds = array<i64: 128, 64>}, {pipeline_mode = #tpu.pipeline_mode<synchronous>, transform_indices = @transform_4, window_bounds = array<i64: 1, 64>}, {pipeline_mode = #tpu.pipeline_mode<synchronous>, transform_indices = @transform_5, window_bounds = array<i64: 64, 32>}, {pipeline_mode = #tpu.pipeline_mode<synchronous>, transform_indices = @transform_6, window_bounds = array<i64: 1, 32>}, {pipeline_mode = #tpu.pipeline_mode<synchronous>, transform_indices = @transform_7, window_bounds = array<i64: 32, 128>}, {pipeline_mode = #tpu.pipeline_mode<synchronous>, transform_indices = @transform_8, window_bounds = array<i64: 1, 128>}, {transform_indices = @transform_9, window_bounds = array<i64: 8, 128>}]} {
    %c0 = arith.constant 0 : index
    %c0_0 = arith.constant 0 : index
    %0 = vector.load %arg1[%c0, %c0_0] : memref<8x784xf32, #tpu.memory_space<vmem>>, vector<8x784xf32>
    %c0_1 = arith.constant 0 : index
    %c0_2 = arith.constant 0 : index
    %1 = vector.load %arg2[%c0_1, %c0_2] : memref<784x128xf32, #tpu.memory_space<vmem>>, vector<784x128xf32>
    %cst = arith.constant dense<0.000000e+00> : vector<8x128xf32>
    %2 = tpu.matmul %0, %1, %cst {dimension_numbers = #tpu.dot_dimension_numbers<[1], [0], [0], [1], [0, 0, 1, 1], [], []>} : vector<8x784xf32>, vector<784x128xf32>, vector<8x128xf32> -> vector<8x128xf32>
    %c0_3 = arith.constant 0 : index
    %c0_4 = arith.constant 0 : index
    %3 = vector.load %arg3[%c0_3, %c0_4] : memref<1x128xf32, #tpu.memory_space<vmem>>, vector<1x128xf32>
    %4 = vector.broadcast %3 : vector<1x128xf32> to vector<8x128xf32>
    %5 = arith.addf %2, %4 : vector<8x128xf32>
    %cst_5 = arith.constant 0.000000e+00 : f32
    %6 = vector.broadcast %cst_5 : f32 to vector<8x128xf32>
    %7 = arith.maximumf %5, %6 : vector<8x128xf32>
    %c0_6 = arith.constant 0 : index
    %c0_7 = arith.constant 0 : index
    %8 = vector.load %arg4[%c0_6, %c0_7] : memref<128x64xf32, #tpu.memory_space<vmem>>, vector<128x64xf32>
    %cst_8 = arith.constant dense<0.000000e+00> : vector<8x64xf32>
    %9 = tpu.matmul %7, %8, %cst_8 {dimension_numbers = #tpu.dot_dimension_numbers<[1], [0], [0], [1], [0, 0, 1, 1], [], []>} : vector<8x128xf32>, vector<128x64xf32>, vector<8x64xf32> -> vector<8x64xf32>
    %c0_9 = arith.constant 0 : index
    %c0_10 = arith.constant 0 : index
    %10 = vector.load %arg5[%c0_9, %c0_10] : memref<1x64xf32, #tpu.memory_space<vmem>>, vector<1x64xf32>
    %11 = vector.broadcast %10 : vector<1x64xf32> to vector<8x64xf32>
    %12 = arith.addf %9, %11 : vector<8x64xf32>
    %cst_11 = arith.constant 0.000000e+00 : f32
    %13 = vector.broadcast %cst_11 : f32 to vector<8x64xf32>
    %14 = arith.maximumf %12, %13 : vector<8x64xf32>
    %c0_12 = arith.constant 0 : index
    %c0_13 = arith.constant 0 : index
    %15 = vector.load %arg6[%c0_12, %c0_13] : memref<64x32xf32, #tpu.memory_space<vmem>>, vector<64x32xf32>
    %cst_14 = arith.constant dense<0.000000e+00> : vector<8x32xf32>
    %16 = tpu.matmul %14, %15, %cst_14 {dimension_numbers = #tpu.dot_dimension_numbers<[1], [0], [0], [1], [0, 0, 1, 1], [], []>} : vector<8x64xf32>, vector<64x32xf32>, vector<8x32xf32> -> vector<8x32xf32>
    %c0_15 = arith.constant 0 : index
    %c0_16 = arith.constant 0 : index
    %17 = vector.load %arg7[%c0_15, %c0_16] : memref<1x32xf32, #tpu.memory_space<vmem>>, vector<1x32xf32>
    %18 = vector.broadcast %17 : vector<1x32xf32> to vector<8x32xf32>
    %19 = arith.addf %16, %18 : vector<8x32xf32>
    %cst_17 = arith.constant 0.000000e+00 : f32
    %20 = vector.broadcast %cst_17 : f32 to vector<8x32xf32>
    %21 = arith.maximumf %19, %20 : vector<8x32xf32>
    %c0_18 = arith.constant 0 : index
    %c0_19 = arith.constant 0 : index
    %22 = vector.load %arg8[%c0_18, %c0_19] : memref<32x128xf32, #tpu.memory_space<vmem>>, vector<32x128xf32>
    %cst_20 = arith.constant dense<0.000000e+00> : vector<8x128xf32>
    %23 = tpu.matmul %21, %22, %cst_20 {dimension_numbers = #tpu.dot_dimension_numbers<[1], [0], [0], [1], [0, 0, 1, 1], [], []>} : vector<8x32xf32>, vector<32x128xf32>, vector<8x128xf32> -> vector<8x128xf32>
    %c0_21 = arith.constant 0 : index
    %c0_22 = arith.constant 0 : index
    %24 = vector.load %arg9[%c0_21, %c0_22] : memref<1x128xf32, #tpu.memory_space<vmem>>, vector<1x128xf32>
    %25 = vector.broadcast %24 : vector<1x128xf32> to vector<8x128xf32>
    %26 = arith.addf %23, %25 : vector<8x128xf32>
    %c0_23 = arith.constant 0 : index
    %c0_24 = arith.constant 0 : index
    %27 = vector.load %arg10[%c0_23, %c0_24] : memref<8x128xf32, #tpu.memory_space<vmem>>, vector<8x128xf32>
    tpu.vector_store %arg10[%c0_23, %c0_24], %26 {strides = array<i32>} : memref<8x128xf32, #tpu.memory_space<vmem>>, vector<8x128xf32>,
    return
  }
  func.func @transform_0(%arg0: i32) -> (i32, i32) {
    %c0_i32 = arith.constant 0 : i32
    %c0_i32_0 = arith.constant 0 : i32
    return %arg0, %c0_i32 : i32, i32
  }
  func.func @transform_1(%arg0: i32) -> (i32, i32) {
    %c0_i32 = arith.constant 0 : i32
    %c0_i32_0 = arith.constant 0 : i32
    %c0_i32_1 = arith.constant 0 : i32
    return %c0_i32, %c0_i32_0 : i32, i32
  }
  func.func @transform_2(%arg0: i32) -> (i32, i32) {
    %c0_i32 = arith.constant 0 : i32
    %c0_i32_0 = arith.constant 0 : i32
    %c0_i32_1 = arith.constant 0 : i32
    return %c0_i32, %c0_i32_0 : i32, i32
  }
  func.func @transform_3(%arg0: i32) -> (i32, i32) {
    %c0_i32 = arith.constant 0 : i32
    %c0_i32_0 = arith.constant 0 : i32
    %c0_i32_1 = arith.constant 0 : i32
    return %c0_i32, %c0_i32_0 : i32, i32
  }
  func.func @transform_4(%arg0: i32) -> (i32, i32) {
    %c0_i32 = arith.constant 0 : i32
    %c0_i32_0 = arith.constant 0 : i32
    %c0_i32_1 = arith.constant 0 : i32
    return %c0_i32, %c0_i32_0 : i32, i32
  }
  func.func @transform_5(%arg0: i32) -> (i32, i32) {
    %c0_i32 = arith.constant 0 : i32
    %c0_i32_0 = arith.constant 0 : i32
    %c0_i32_1 = arith.constant 0 : i32
    return %c0_i32, %c0_i32_0 : i32, i32
  }
  func.func @transform_6(%arg0: i32) -> (i32, i32) {
    %c0_i32 = arith.constant 0 : i32
    %c0_i32_0 = arith.constant 0 : i32
    %c0_i32_1 = arith.constant 0 : i32
    return %c0_i32, %c0_i32_0 : i32, i32
  }
  func.func @transform_7(%arg0: i32) -> (i32, i32) {
    %c0_i32 = arith.constant 0 : i32
    %c0_i32_0 = arith.constant 0 : i32
    %c0_i32_1 = arith.constant 0 : i32
    return %c0_i32, %c0_i32_0 : i32, i32
  }
  func.func @transform_8(%arg0: i32) -> (i32, i32) {
    %c0_i32 = arith.constant 0 : i32
    %c0_i32_0 = arith.constant 0 : i32
    %c0_i32_1 = arith.constant 0 : i32
    return %c0_i32, %c0_i32_0 : i32, i32
  }
  func.func @transform_9(%arg0: i32) -> (i32, i32) {
    %c0_i32 = arith.constant 0 : i32
    %c0_i32_0 = arith.constant 0 : i32
    return %arg0, %c0_i32 : i32, i32
  }
}

</mosaic_0001>

<bundles_post_ra>
// kernel: tpu_custom_call.1
= control target key start
LH: loop header
LB: loop body
LE: loop exit
PB: predicated region body
PF: predicated region fallthrough
CT: control target
= control target key end

     0   :  { %14 = vsyncpa [#allocation3], 0  ;;  %s1364_s0 = inlined_call_operand.vmem [shape: f32[8,784], index: 0, kind: input, shape index: {}]   ;;  %s1365_s1 = inlined_call_operand.hbm [shape: f32[784,128], index: 1, kind: input, shape index: {}]   ;;  %s1366_s2 = inlined_call_operand.vmem [shape: f32[1,128], index: 2, kind: input, shape index: {}]   ;;  %s1367_s3 = inlined_call_operand.vmem [shape: f32[128,64], index: 3, kind: input, shape index: {}]   ;;  %s1368_s4 = inlined_call_operand.vmem [shape: f32[1,64], index: 4, kind: input, shape index: {}]   ;;  %s1369_s5 = inlined_call_operand.vmem [shape: f32[64,32], index: 5, kind: input, shape index: {}]   ;;  %s1370_s6 = inlined_call_operand.vmem [shape: f32[1,32], index: 6, kind: input, shape index: {}]   ;;  %s1371_s7 = inlined_call_operand.vmem [shape: f32[32,128], index: 7, kind: input, shape index: {}]   ;;  %s1372_s8 = inlined_call_operand.vmem [shape: f32[1,128], index: 8, kind: input, shape index: {}]   ;;  %s1373_s9 = inlined_call_operand.hbm [shape: f32[8,128], index: 9, kind: output, shape index: {}]  }
   0x1   :  { %15 = vsyncpa [#allocation4], 0  ;;  %s1143_s30 = smov [#allocation2]   ;;  %s1095_s13 = scalar_lea.hbm %s1365_s1, 12544 }
   0x2   :  { %s23_s10 = sshll.u32 %s1143_s30, 4  ;;  %p1096_p0 = scmp.ne.s32.totalorder %s1365_s1, %s1095_s13  ;;  %s24_s10 = int_to_ptr.vmem [resolvable:$true] %s23_s10 }
   0x3   :  { %p1099_p1 = scmp.lt.u32.totalorder %s1095_s13, %s1365_s1 }
   0x5   :  { %p1101_p2 = pnand %p1099_p1, %p1096_p0 }
   0x7   :  { %1104 = shalt.err (!%p1101_p2)
}
   0x8   :  { %s1105_s18 = scalar_lea.vmem %s24_s10, 12544  ;;  %p1110_p4 = scmp.lt.s32.totalorder %s24_s10, %s24_s10 }
   0x9   :  { %p1106_p3 = scmp.ne.s32.totalorder %s24_s10, %s1105_s18  ;;  %p1111_p5 = scmp.lt.s32.totalorder %s1105_s18, %s1105_s18 }
   0xb   :  { %p1112_p6 = por %p1111_p5, %p1110_p4 }
   0xd   :  { %p1113_p7 = pnand %p1112_p6, %p1106_p3 }
   0xf   :  { %1116 = shalt.err (!%p1113_p7)
}
  0x10   :  { %s1144_s19 = smov 128   ;;  %s1145_s20 = smov 8  }
  0x11   :  { %29 = dma.hbm_to_vmem [thread:$0]  %s1365_s1, 12544, %s24_s10, [#allocation3], %s1144_s19, %s1144_s19, %s1145_s20  }
  0x12   :  { %1139 = dma.done.wait [#allocation3], 12544  }
  0x13   :  { %1140 = vsyncadd [#allocation3], 4294954752  ;;  %v70_v0 = vld [vmem:[#allocation2 + $0x80] sm:$0xff]  ;;  %v71_v1 = vld [vmem:[#allocation2 + $0x88] sm:$0xff]  ;;  %vm1147_vm0 = vmmov 0   ;;  %vm159_vm1 = vcmask 130048  }
  0x14   :  { %v54_v2 = vld [vmem:[#allocation2] sm:$0xff]  ;;  %v947_v3 = vpack.c.bf16 %v71_v1, %v70_v0  ;;  %v55_v4 = vld [vmem:[#allocation2 + $0x8] sm:$0xff]  ;;  %v72_v11 = vld [vmem:[#allocation2 + $0x90] sm:$0xff]  ;;  %vm553_vm2 = vcmask 523264   ;;  %vm639_vm3 = vcmask 261120   ;;  %s1149_s27 = smov [#allocation5]  }
  0x15   :  { %v102_v5 = vld [vmem:[#allocation2 + $0x180] sm:$0xff]  ;;  %v103_v6 = vld [vmem:[#allocation2 + $0x188] sm:$0xff]  ;;  %v949_v7 = vpack.c.bf16 %v55_v4, %v54_v2  ;;  %v73_v13 = vld [vmem:[#allocation2 + $0x98] sm:$0xff]  ;;  %s720_s28 = sshll.u32 %s1149_s27, 4  ;;  %s721_s28 = int_to_ptr.vmem [resolvable:$true] %s720_s28 }
  0x16   :  { %v979_v8 = vpack.c.bf16 %v103_v6, %v102_v5  ;;  %v86_v9 = vld [vmem:[#allocation2 + $0x100] sm:$0xff]  ;;  %v87_v10 = vld [vmem:[#allocation2 + $0x108] sm:$0xff]  ;;  %948 = vmatprep.subr.bf16.mxu0 %v947_v3  ;;  %v56_v14 = vld [vmem:[#allocation2 + $0x10] sm:$0xff]  ;;  %v951_v16 = vpack.c.bf16 %v73_v13, %v72_v11  ;;  %p1122_p9 = scmp.lt.s32.totalorder %s721_s28, %s721_s28 }
  0x17   :  { %v981_v12 = vpack.c.bf16 %v87_v10, %v86_v9  ;;  %v57_v15 = vld [vmem:[#allocation2 + $0x18] sm:$0xff]  ;;  %950 = vmatpush3.bf16.msra.mxu0 %v949_v7  ;;  %v104_v18 = vld [vmem:[#allocation2 + $0x190] sm:$0xff]  ;;  %v74_v23 = vld [vmem:[#allocation2 + $0xa0] sm:$0xff] }
  0x18   :  { %980 = vmatprep.subr.bf16.mxu1 %v979_v8  ;;  %v953_v17 = vpack.c.bf16 %v57_v15, %v56_v14  ;;  %v105_v19 = vld [vmem:[#allocation2 + $0x198] sm:$0xff]  ;;  %v88_v20 = vld [vmem:[#allocation2 + $0x110] sm:$0xff]  ;;  %v75_v24 = vld [vmem:[#allocation2 + $0xa8] sm:$0xff]  ;;  %952 = vmatprep.subr.bf16.mxu0 %v951_v16 }
  0x19   :  { %982 = vmatpush3.bf16.msra.mxu1 %v981_v12  ;;  %v983_v21 = vpack.c.bf16 %v105_v19, %v104_v18  ;;  %v89_v22 = vld [vmem:[#allocation2 + $0x118] sm:$0xff]  ;;  %v955_v26 = vpack.c.bf16 %v75_v24, %v74_v23  ;;  %v58_v27 = vld [vmem:[#allocation2 + $0x20] sm:$0xff]  ;;  %v59_v28 = vld [vmem:[#allocation2 + $0x28] sm:$0xff] }
  0x1a   :  { %v985_v25 = vpack.c.bf16 %v89_v22, %v88_v20  ;;  %v106_v29 = vld [vmem:[#allocation2 + $0x1a0] sm:$0xff]  ;;  %v107_v30 = vld [vmem:[#allocation2 + $0x1a8] sm:$0xff]  ;;  %v957_v33 = vpack.c.bf16 %v59_v28, %v58_v27  ;;  %v76_v35 = vld [vmem:[#allocation2 + $0xb0] sm:$0xff] }
  0x1b   :  { %984 = vmatprep.subr.bf16.mxu1 %v983_v21  ;;  %v90_v31 = vld [vmem:[#allocation2 + $0x120] sm:$0xff]  ;;  %v91_v32 = vld [vmem:[#allocation2 + $0x128] sm:$0xff]  ;;  %954 = vmatpush3.bf16.msra.mxu0 %v953_v17  ;;  %v987_v34 = vpack.c.bf16 %v107_v30, %v106_v29  ;;  %v77_v36 = vld [vmem:[#allocation2 + $0xb8] sm:$0xff] }
  0x1c   :  { %v60_v37 = vld [vmem:[#allocation2 + $0x30] sm:$0xff]  ;;  %956 = vmatprep.subr.bf16.mxu0 %v955_v26  ;;  %v989_v38 = vpack.c.bf16 %v91_v32, %v90_v31  ;;  %v959_v39 = vpack.c.bf16 %v77_v36, %v76_v35  ;;  %v61_v40 = vld [vmem:[#allocation2 + $0x38] sm:$0xff]  ;;  %v78_v46 = vld [vmem:[#allocation2 + $0xc0] sm:$0xff] }
  0x1d   :  { %986 = vmatpush3.bf16.msra.mxu1 %v985_v25  ;;  %v108_v41 = vld [vmem:[#allocation2 + $0x1b0] sm:$0xff]  ;;  %v109_v42 = vld [vmem:[#allocation2 + $0x1b8] sm:$0xff]  ;;  %v79_v47 = vld [vmem:[#allocation2 + $0xc8] sm:$0xff]  ;;  %v961_v48 = vpack.c.bf16 %v61_v40, %v60_v37 }
  0x1e   :  { %988 = vmatprep.subr.bf16.mxu1 %v987_v34  ;;  %v991_v43 = vpack.c.bf16 %v109_v42, %v108_v41  ;;  %v92_v44 = vld [vmem:[#allocation2 + $0x130] sm:$0xff]  ;;  %v93_v45 = vld [vmem:[#allocation2 + $0x138] sm:$0xff]  ;;  %v110_v49 = vld [vmem:[#allocation2 + $0x1c0] sm:$0xff]  ;;  %v963_v52 = vpack.c.bf16 %v79_v47, %v78_v46 }
  0x1f   :  { %958 = vmatpush3.bf16.msra.mxu0 %v957_v33  ;;  %v111_v50 = vld [vmem:[#allocation2 + $0x1c8] sm:$0xff]  ;;  %v993_v51 = vpack.c.bf16 %v93_v45, %v92_v44  ;;  %v62_v53 = vld [vmem:[#allocation2 + $0x40] sm:$0xff]  ;;  %v80_v58 = vld [vmem:[#allocation2 + $0xd0] sm:$0xff] }
  0x20   :  { %960 = vmatprep.subr.bf16.mxu0 %v959_v39  ;;  %v63_v54 = vld [vmem:[#allocation2 + $0x48] sm:$0xff]  ;;  %v94_v55 = vld [vmem:[#allocation2 + $0x140] sm:$0xff]  ;;  %v995_v56 = vpack.c.bf16 %v111_v50, %v110_v49  ;;  %v81_v59 = vld [vmem:[#allocation2 + $0xd8] sm:$0xff]  ;;  %v1146_v50 = vmov 0.0|0.0  }
  0x21   :  { %990 = vmatpush3.bf16.msra.mxu1 %v989_v38  ;;  %v95_v57 = vld [vmem:[#allocation2 + $0x148] sm:$0xff]  ;;  %v112_v60 = vld [vmem:[#allocation2 + $0x1d0] sm:$0xff]  ;;  %v113_v61 = vld [vmem:[#allocation2 + $0x1d8] sm:$0xff]  ;;  %v965_v62 = vpack.c.bf16 %v63_v54, %v62_v53  ;;  %v967_v0 = vpack.c.bf16 %v81_v59, %v80_v58 }
  0x22   :  { %992 = vmatprep.subr.bf16.mxu1 %v991_v43  ;;  %v997_v63 = vpack.c.bf16 %v95_v57, %v94_v55  ;;  %v64_v1 = vld [vmem:[#allocation2 + $0x50] sm:$0xff]  ;;  %v65_v2 = vld [vmem:[#allocation2 + $0x58] sm:$0xff]  ;;  %v999_v4 = vpack.c.bf16 %v113_v61, %v112_v60  ;;  %v82_v6 = vld [vmem:[#allocation2 + $0xe0] sm:$0xff]  ;;  %v1148_v60 = vmov 0.0  }
  0x23   :  { %962 = vmatpush3.bf16.msra.mxu0 %v961_v48  ;;  %v96_v3 = vld [vmem:[#allocation2 + $0x150] sm:$0xff]  ;;  %v97_v5 = vld [vmem:[#allocation2 + $0x158] sm:$0xff]  ;;  %v83_v7 = vld [vmem:[#allocation2 + $0xe8] sm:$0xff]  ;;  %v969_v10 = vpack.c.bf16 %v65_v2, %v64_v1 }
  0x24   :  { %964 = vmatprep.subr.bf16.mxu0 %v963_v52  ;;  %v114_v8 = vld [vmem:[#allocation2 + $0x1e0] sm:$0xff]  ;;  %v115_v9 = vld [vmem:[#allocation2 + $0x1e8] sm:$0xff]  ;;  %v1001_v13 = vpack.c.bf16 %v97_v5, %v96_v3  ;;  %v971_v14 = vpack.c.bf16 %v83_v7, %v82_v6  ;;  %v84_v19 = vld [vmem:[#allocation2 + $0xf0] sm:$0xff] }
  0x25   :  { %994 = vmatpush3.bf16.msra.mxu1 %v993_v51  ;;  %v66_v11 = vld [vmem:[#allocation2 + $0x60] sm:$0xff]  ;;  %v48_v12 = vld [vmem:[%s1364_s0 + $0x8] sm:$0xff]  ;;  %v1003_v18 = vpack.c.bf16 %v115_v9, %v114_v8  ;;  %v85_v20 = vld [vmem:[#allocation2 + $0xf8] sm:$0xff] }
  0x26   :  { %996 = vmatprep.subr.bf16.mxu1 %v995_v56  ;;  %v67_v15 = vld [vmem:[#allocation2 + $0x68] sm:$0xff]  ;;  %v98_v16 = vld [vmem:[#allocation2 + $0x160] sm:$0xff]  ;;  %227 = vmatprep.mubr.f32.mxu0 %v48_v12  ;;  %v50_v21 = vld [vmem:[%s1364_s0 + $0x18] sm:$0xff]  ;;  %v975_v26 = vpack.c.bf16 %v85_v20, %v84_v19 }
  0x27   :  { %966 = vmatpush3.bf16.msra.mxu0 %v965_v62  ;;  %v99_v17 = vld [vmem:[#allocation2 + $0x168] sm:$0xff]  ;;  %v116_v22 = vld [vmem:[#allocation2 + $0x1f0] sm:$0xff]  ;;  %v117_v23 = vld [vmem:[#allocation2 + $0x1f8] sm:$0xff]  ;;  %297 = vmatprep.mubr.f32.mxu1 %v50_v21  ;;  %v973_v24 = vpack.c.bf16 %v67_v15, %v66_v11 }
  0x28   :  { %968 = vmatprep.subr.bf16.mxu0 %v967_v0  ;;  %v1005_v25 = vpack.c.bf16 %v99_v17, %v98_v16  ;;  %v68_v27 = vld [vmem:[#allocation2 + $0x70] sm:$0xff]  ;;  %v69_v28 = vld [vmem:[#allocation2 + $0x78] sm:$0xff]  ;;  %v1007_v30 = vpack.c.bf16 %v117_v23, %v116_v22  ;;  %v134_v32 = vld [vmem:[#allocation2 + $0x280] sm:$0xff] }
  0x29   :  { %998 = vmatpush3.bf16.msra.mxu1 %v997_v63  ;;  %v100_v29 = vld [vmem:[#allocation2 + $0x170] sm:$0xff]  ;;  %v101_v31 = vld [vmem:[#allocation2 + $0x178] sm:$0xff]  ;;  %v135_v33 = vld [vmem:[#allocation2 + $0x288] sm:$0xff]  ;;  %v977_v34 = vpack.c.bf16 %v69_v28, %v68_v27 }
  0x2a   :  { %1000 = vmatprep.subr.bf16.mxu1 %v999_v4  ;;  %v1009_v35 = vpack.c.bf16 %v101_v31, %v100_v29  ;;  %v1011_v36 = vpack.c.bf16 %v135_v33, %v134_v32  ;;  %v118_v37 = vld [vmem:[#allocation2 + $0x200] sm:$0xff]  ;;  %v119_v38 = vld [vmem:[#allocation2 + $0x208] sm:$0xff]  ;;  %v136_v39 = vld [vmem:[#allocation2 + $0x290] sm:$0xff] }
  0x2b   :  { %970 = vmatpush3.bf16.msra.mxu0 %v969_v10  ;;  %v137_v40 = vld [vmem:[#allocation2 + $0x298] sm:$0xff]  ;;  %v47_v41 = vld [vmem:[%s1364_s0] sm:$0xff]  ;;  %v1013_v42 = vpack.c.bf16 %v119_v38, %v118_v37  ;;  %v49_v43 = vld [vmem:[%s1364_s0 + $0x10] sm:$0xff] }
  0x2c   :  { %972 = vmatprep.subr.bf16.mxu0 %v971_v14  ;;  %v120_v44 = vld [vmem:[#allocation2 + $0x210] sm:$0xff]  ;;  %v1015_v45 = vpack.c.bf16 %v137_v40, %v136_v39  ;;  %v121_v46 = vld [vmem:[#allocation2 + $0x218] sm:$0xff]  ;;  %v138_v47 = vld [vmem:[#allocation2 + $0x2a0] sm:$0xff] }
  0x2d   :  { %1002 = vmatpush3.bf16.msra.mxu1 %v1001_v13  ;;  %v139_v48 = vld [vmem:[#allocation2 + $0x2a8] sm:$0xff]  ;;  %v150_v51 = vld [vmem:[#allocation2 + $0x300] sm:$0xff]  ;;  %v1017_v54 = vpack.c.bf16 %v121_v46, %v120_v44  ;;  %v140_v58 = vld [vmem:[#allocation2 + $0x2b0] sm:$0xff] }
  0x2e   :  { %1004 = vmatprep.subr.bf16.mxu1 %v1003_v18  ;;  %v52_v49 = vld [vmem:[%s1364_s0 + $0x28] sm:$0xff]  ;;  %v1019_v55 = vpack.c.bf16 %v139_v48, %v138_v47  ;;  %v122_v56 = vld [vmem:[#allocation2 + $0x220] sm:$0xff]  ;;  %v141_v59 = vld [vmem:[#allocation2 + $0x2b8] sm:$0xff] }
  0x2f   :  { %974 = vmatpush3.bf16.msra.mxu0 %v973_v24  ;;  %v151_v52 = vld [vmem:[#allocation2 + $0x308] sm:$0xff]  ;;  %v53_v61 = vld [vmem:[%s1364_s0 + $0x30] sm:$0xff]  ;;  %v1023_v63 = vpack.c.bf16 %v141_v59, %v140_v58  ;;  %v125_v1 = vld [vmem:[#allocation2 + $0x238] sm:$0xff] }
  0x30   :  { %976 = vmatprep.subr.bf16.mxu0 %v975_v26  ;;  %v1044_v53 = vpack.c.bf16 %v151_v52, %v150_v51  ;;  %v123_v57 = vld [vmem:[#allocation2 + $0x228] sm:$0xff]  ;;  %v124_v0 = vld [vmem:[#allocation2 + $0x230] sm:$0xff]  ;;  %v142_v2 = vld [vmem:[#allocation2 + $0x2c0] sm:$0xff] }
  0x31   :  { %1006 = vmatpush3.bf16.msra.mxu1 %v1005_v25  ;;  %v1021_v62 = vpack.c.bf16 %v123_v57, %v122_v56  ;;  %v143_v3 = vld [vmem:[#allocation2 + $0x2c8] sm:$0xff]  ;;  %v1025_v4 = vpack.c.bf16 %v125_v1, %v124_v0  ;;  %v126_v6 = vld [vmem:[#allocation2 + $0x240] sm:$0xff]  ;;  %v144_v8 = vld [vmem:[#allocation2 + $0x2d0] sm:$0xff] }
  0x32   :  { %1008 = vmatprep.subr.bf16.mxu1 %v1007_v30  ;;  %v1027_v5 = vpack.c.bf16 %v143_v3, %v142_v2  ;;  %v127_v7 = vld [vmem:[#allocation2 + $0x248] sm:$0xff]  ;;  %v145_v9 = vld [vmem:[#allocation2 + $0x2d8] sm:$0xff]  ;;  %v128_v12 = vld [vmem:[#allocation2 + $0x250] sm:$0xff] }
  0x33   :  { %978 = vmatpush3.bf16.msra.mxu0 %v977_v34  ;;  %v1029_v10 = vpack.c.bf16 %v127_v7, %v126_v6  ;;  %v1031_v11 = vpack.c.bf16 %v145_v9, %v144_v8  ;;  %v129_v13 = vld [vmem:[#allocation2 + $0x258] sm:$0xff]  ;;  %v146_v14 = vld [vmem:[#allocation2 + $0x2e0] sm:$0xff]  ;;  %v147_v15 = vld [vmem:[#allocation2 + $0x2e8] sm:$0xff] }
  0x34   :  { %1012 = vmatprep.subr.bf16.mxu0 %v1011_v36  ;;  %v1033_v16 = vpack.c.bf16 %v129_v13, %v128_v12  ;;  %v1035_v17 = vpack.c.bf16 %v147_v15, %v146_v14  ;;  %v130_v18 = vld [vmem:[#allocation2 + $0x260] sm:$0xff]  ;;  %v131_v19 = vld [vmem:[#allocation2 + $0x268] sm:$0xff]  ;;  %v148_v20 = vld [vmem:[#allocation2 + $0x2f0] sm:$0xff] }
  0x35   :  { %1010 = vmatpush3.bf16.msra.mxu1 %v1009_v35  ;;  %v149_v21 = vld [vmem:[#allocation2 + $0x2f8] sm:$0xff]  ;;  %v1037_v22 = vpack.c.bf16 %v131_v19, %v130_v18  ;;  %v132_v24 = vld [vmem:[#allocation2 + $0x270] sm:$0xff]  ;;  %v51_v27 = vld [vmem:[%s1364_s0 + $0x20] sm:$0xff] }
  0x36   :  { %1043 = vmatprep.subr.bf16.mxu1 %v1146_v50  ;;  %228 = vmatmul.mubr.f32.vlgmr.msra.gmra.mrb[0].mxu0 %v47_v41  ;;  %v1039_v23 = vpack.c.bf16 %v149_v21, %v148_v20  ;;  %v133_v25 = vld [vmem:[#allocation2 + $0x278] sm:$0xff]  ;;  %v444_v28 = vld [vmem:[%s1367_s3] sm:$0xff]  ;;  %v445_v29 = vld [vmem:[%s1367_s3 + $0x8] sm:$0xff] }
  0x37   :  { %1014 = vmatpush3.bf16.msra.mxu0 %v1013_v42  ;;  %367 = vmatprep.mubr.f32.mxu0 %v52_v49  ;;  %v1041_v26 = vpack.c.bf16 %v133_v25, %v132_v24  ;;  %v446_v30 = vld [vmem:[%s1367_s3 + $0x10] sm:$0xff]  ;;  %v1047_v31 = vpack.c.bf16 %v445_v29, %v444_v28  ;;  %v447_v32 = vld [vmem:[%s1367_s3 + $0x18] sm:$0xff]  ;;  %v448_v34 = vld [vmem:[%s1367_s3 + $0x20] sm:$0xff] }
  0x38   :  { %298 = vmatmul.mubr.f32.vlgmr.msra.gmra.mrb[0].mxu1 %v49_v43  ;;  %1016 = vmatprep.subr.bf16.mxu0 %v1015_v45  ;;  %v1050_v33 = vpack.c.bf16 %v447_v32, %v446_v30  ;;  %v449_v35 = vld [vmem:[%s1367_s3 + $0x28] sm:$0xff]  ;;  %v450_v37 = vld [vmem:[%s1367_s3 + $0x30] sm:$0xff]  ;;  %v451_v38 = vld [vmem:[%s1367_s3 + $0x38] sm:$0xff] }
  0x39   :  { %1045 = vmatpush3.bf16.msra.mxu1 %v1044_v53  ;;  %879 = vmatprep.mubr.msk.f32.mxu1 %vm1147_vm0, %v1148_v60  ;;  %v1053_v36 = vpack.c.bf16 %v449_v35, %v448_v34  ;;  %v1056_v39 = vpack.c.bf16 %v451_v38, %v450_v37  ;;  %v452_v40 = vld [vmem:[%s1367_s3 + $0x40] sm:$0xff]  ;;  %v453_v41 = vld [vmem:[%s1367_s3 + $0x48] sm:$0xff]  ;;  %v454_v43 = vld [vmem:[%s1367_s3 + $0x50] sm:$0xff] }
  0x3a   :  { %1046 = vmatprep.subr.bf16.mxu1 %v1146_v50  ;;  %v1059_v42 = vpack.c.bf16 %v453_v41, %v452_v40  ;;  %v455_v44 = vld [vmem:[%s1367_s3 + $0x58] sm:$0xff]  ;;  %v456_v46 = vld [vmem:[%s1367_s3 + $0x60] sm:$0xff]  ;;  %v457_v47 = vld [vmem:[%s1367_s3 + $0x68] sm:$0xff] }
  0x3b   :  { %1018 = vmatpush3.bf16.msra.mxu0 %v1017_v54  ;;  %v1062_v45 = vpack.c.bf16 %v455_v44, %v454_v43  ;;  %v1065_v48 = vpack.c.bf16 %v457_v47, %v456_v46  ;;  %v458_v49 = vld [vmem:[%s1367_s3 + $0x70] sm:$0xff]  ;;  %v459_v51 = vld [vmem:[%s1367_s3 + $0x78] sm:$0xff]  ;;  %v538_v53 = vld [vmem:[%s1369_s5] sm:$0xff] }
  0x3c   :  { %1020 = vmatprep.subr.bf16.mxu0 %v1019_v55  ;;  %880 = vmatmul.mubr.msk.f32.vlgmr.msra.gmra.mrb[2].mxu1 %vm159_vm1, %v53_v61  ;;  %v1068_v52 = vpack.c.bf16 %v459_v51, %v458_v49  ;;  %v539_v54 = vld [vmem:[%s1369_s5 + $0x8] sm:$0xff]  ;;  %v540_v55 = vld [vmem:[%s1369_s5 + $0x10] sm:$0xff]  ;;  %v541_v57 = vld [vmem:[%s1369_s5 + $0x18] sm:$0xff] }
  0x3d   :  { %914 = vmatprep.mubr.msk.f32.mxu1 %vm1147_vm0, %v1148_v60  ;;  %1048 = vmatpush3.bf16.msra.mxu1 %v1047_v31  ;;  %v1071_v56 = vpack.c.bf16 %v539_v54, %v538_v53  ;;  %v1074_v58 = vpack.c.bf16 %v541_v57, %v540_v55  ;;  %v542_v59 = vld [vmem:[%s1369_s5 + $0x20] sm:$0xff]  ;;  %v543_v61 = vld [vmem:[%s1369_s5 + $0x28] sm:$0xff] }
  0x3e   :  { %1049 = vmatprep.subr.bf16.mxu1 %v1146_v50  ;;  %v729_v0 = vld [vmem:[%s1366_s2] ss:$0 sm:$0xff]  ;;  %v629_v20 = vld [vmem:[%s1371_s7 + $0x8] sm:$0xff] }
  0x3f   :  { %1022 = vmatpush3.bf16.msra.mxu0 %v1021_v62  ;;  %v1077_v62 = vpack.c.bf16 %v543_v61, %v542_v59  ;;  %v628_v19 = vld [vmem:[%s1371_s7] sm:$0xff] }
  0x40   :  { %1024 = vmatprep.subr.bf16.mxu0 %v1023_v63  ;;  %v1083_v21 = vpack.c.bf16 %v629_v20, %v628_v19 }
  0x41   :  { %1051 = vmatpush3.bf16.msra.mxu1 %v1050_v33  ;;  %v734_v33 = vld [vmem:[%s1372_s8] ss:$0 sm:$0xff] }
  0x42   :  { %1052 = vmatprep.subr.bf16.mxu1 %v1146_v50 }
  0x43   :  { %1026 = vmatpush3.bf16.msra.mxu0 %v1025_v4 }
  0x44   :  { %1028 = vmatprep.subr.bf16.mxu0 %v1027_v5 }
  0x45   :  { %1054 = vmatpush3.bf16.msra.mxu1 %v1053_v36 }
  0x46   :  { %1055 = vmatprep.subr.bf16.mxu1 %v1146_v50 }
  0x47   :  { %1030 = vmatpush3.bf16.msra.mxu0 %v1029_v10 }
  0x48   :  { %1032 = vmatprep.subr.bf16.mxu0 %v1031_v11 }
  0x49   :  { %1057 = vmatpush3.bf16.msra.mxu1 %v1056_v39 }
  0x4a   :  { %1058 = vmatprep.subr.bf16.mxu1 %v1146_v50 }
  0x4b   :  { %1034 = vmatpush3.bf16.msra.mxu0 %v1033_v16  ;;  %v544_v16 = vld [vmem:[%s1369_s5 + $0x30] sm:$0xff] }
  0x4c   :  { %1036 = vmatprep.subr.bf16.mxu0 %v1035_v17  ;;  %v545_v17 = vld [vmem:[%s1369_s5 + $0x38] sm:$0xff] }
  0x4d   :  { %1060 = vmatpush3.bf16.msra.mxu1 %v1059_v42  ;;  %v1080_v18 = vpack.c.bf16 %v545_v17, %v544_v16 }
  0x4e   :  { %1061 = vmatprep.subr.bf16.mxu1 %v1146_v50 }
  0x4f   :  { %1038 = vmatpush3.bf16.msra.mxu0 %v1037_v22 }
  0x50   :  { %1040 = vmatprep.subr.bf16.mxu0 %v1039_v23 }
  0x51   :  { %1063 = vmatpush3.bf16.msra.mxu1 %v1062_v45 }
  0x52   :  { %1064 = vmatprep.subr.bf16.mxu1 %v1146_v50 }
  0x53   :  { %1042 = vmatpush3.bf16.msra.mxu0 %v1041_v26  ;;  %v630_v26 = vld [vmem:[%s1371_s7 + $0x10] sm:$0xff] }
  0x54   :  { %1070 = vmatprep.subr.bf16.mxu0 %v1146_v50 }
  0x55   :  { %1066 = vmatpush3.bf16.msra.mxu1 %v1065_v48 }
  0x56   :  { %368 = vmatmul.mubr.f32.vlgmr.msra.gmra.mrb[2].mxu0 %v51_v27  ;;  %1067 = vmatprep.subr.bf16.mxu1 %v1146_v50  ;;  %v631_v27 = vld [vmem:[%s1371_s7 + $0x18] sm:$0xff]  ;;  %s1117_s7 = scalar_lea.vmem %s721_s28, 128 }
  0x57   :  { %933 = vmatprep.mubr.msk.f32.mxu0 %vm1147_vm0, %v1148_v60  ;;  %1072 = vmatpush3.bf16.msra.mxu0 %v1071_v56  ;;  %v1086_v28 = vpack.c.bf16 %v631_v27, %v630_v26  ;;  %p1118_p8 = scmp.ne.s32.totalorder %s721_s28, %s1117_s7  ;;  %p1123_p10 = scmp.lt.s32.totalorder %s1117_s7, %s1117_s7 }
  0x58   :  { %1073 = vmatprep.subr.bf16.mxu0 %v1146_v50 }
  0x59   :  { %1069 = vmatpush3.bf16.msra.mxu1 %v1068_v52  ;;  %p1124_p11 = por %p1123_p10, %p1122_p9 }
  0x5a   :  { %1082 = vmatprep.subr.bf16.mxu1 %v1146_v50 }
  0x5b   :  { %1075 = vmatpush3.bf16.msra.mxu0 %v1074_v58  ;;  %p1125_p12 = pnand %p1124_p11, %p1118_p8 }
  0x5c   :  { %1076 = vmatprep.subr.bf16.mxu0 %v1146_v50 }
  0x5f   :  { %1078 = vmatpush3.bf16.msra.mxu0 %v1077_v62 }
  0x60   :  { %1079 = vmatprep.subr.bf16.mxu0 %v1146_v50 }
  0x63   :  { %1081 = vmatpush3.bf16.msra.mxu0 %v1080_v18 }
 0x109   :  { %v768_v63 = vpop.f32.mrb[0].mxu0 }
 0x10a   :  { %v769_v1 = vpop.f32.mrb[1].mxu0 }
 0x10b   :  { %v803_v2 = vpop.f32.mrb[0].mxu1  ;;  %v770_v3 = vadd.f32 %v769_v1, %v768_v63 }
 0x10c   :  { %v804_v4 = vpop.f32.mrb[1].mxu1 }
 0x10d   :  { %v805_v5 = vadd.f32 %v804_v4, %v803_v2  ;;  %v230_v6 = vadd.f32 %v770_v3, %v729_v0 }
 0x10f   :  { %v300_v7 = vadd.f32 %v805_v5, %v230_v6  ;;  %v439_v8 = vpop.f32.mrb[2].mxu1 }
 0x110   :  { %v881_v9 = vpop.f32.mrb[3].mxu1 }
 0x129   :  { %v838_v10 = vpop.f32.mrb[2].mxu0 }
 0x12a   :  { %v839_v11 = vpop.f32.mrb[3].mxu0 }
 0x12b   :  { %v840_v12 = vadd.f32 %v839_v11, %v838_v10 }
 0x12d   :  { %v370_v13 = vadd.f32 %v840_v12, %v300_v7 }
 0x12f   :  { %v440_v14 = vadd.f32 %v439_v8, %v370_v13 }
 0x131   :  { %v443_v15 = vmax.f32 %v440_v14, 0.0 }
 0x133   :  { %915 = vmatmul.mubr.f32.vlgmr.msra.gmra.mrb[4].mxu1 %v443_v15 }
 0x134   :  { %944 = vmatprep.mubr.msk.f32.mxu1 %vm1147_vm0, %v1148_v60  ;;  %1084 = vmatpush3.bf16.msra.mxu1 %v1083_v21  ;;  %v731_v60 = vld [vmem:[%s1368_s4] ss:$0 sm:$0xff] }
 0x135   :  { %1085 = vmatprep.subr.bf16.mxu1 %v1146_v50  ;;  %v732_v50 = vld [vmem:[%s1370_s6] ss:$0 sm:$0xff] }
 0x138   :  { %1087 = vmatpush3.bf16.msra.mxu1 %v1086_v28 }
 0x206   :  { %v533_v22 = vpop.f32.mrb[4].mxu1 }
 0x207   :  { %v534_v23 = vadd.f32 %v731_v60, %v533_v22  ;;  %v916_v24 = vpop.f32.mrb[5].mxu1 }
 0x209   :  { %v537_v25 = vmax.f32 %v534_v23, 0.0 }
 0x20b   :  { %934 = vmatmul.mubr.msk.f32.vlgmr.msra.gmra.mrb[4].mxu0 %vm553_vm2, %v537_v25 }
 0x2de   :  { %v623_v29 = vpop.f32.mrb[4].mxu0 }
 0x2df   :  { %v624_v30 = vadd.f32 %v732_v50, %v623_v29  ;;  %v935_v31 = vpop.f32.mrb[5].mxu0 }
 0x2e1   :  { %v627_v32 = vmax.f32 %v624_v30, 0.0 }
 0x2e3   :  { %945 = vmatmul.mubr.msk.f32.vlgmr.msra.gmra.mrb[6].mxu1 %vm639_vm3, %v627_v32 }
 0x3b6   :  { %v709_v34 = vpop.f32.mrb[6].mxu1 }
 0x3b7   :  { %v710_v35 = vadd.f32 %v734_v33, %v709_v34  ;;  %v946_v36 = vpop.f32.mrb[7].mxu1 }
 0x3b9   :  { %713 = vst [vmem:[#allocation5] sm:$0xff] %v710_v35 }
 0x3ba   :  { %1128 = shalt.err (!%p1125_p12)
}
 0x3bb   :  { %s1129_s3 = scalar_lea.hbm %s1373_s9, 128 }
 0x3bc   :  { %p1130_p13 = scmp.ne.s32.totalorder %s1373_s9, %s1129_s3  ;;  %p1133_p0 = scmp.lt.u32.totalorder %s1129_s3, %s1373_s9 }
 0x3be   :  { %p1135_p1 = pnand %p1133_p0, %p1130_p13 }
 0x3c0   :  { %1138 = shalt.err (!%p1135_p1)
}
 0x3c1   :  { %723 = dma.vmem_to_hbm [thread:$0]  %s721_s28, 128, %s1373_s9, [#allocation4]  }
 0x3c2   :  { %1141 = dma.done.wait [#allocation4], 128  }
 0x3c3   :  { %1142 = vsyncadd [#allocation4], 4294967168 }
 0x3c4   :  { %727 = vsyncpa [#allocation3], 1 }
 0x3c5   :  { %728 = vsyncpa [#allocation4], 1 }

</bundles_post_ra>
